<compile_context>
chip_gen: v7x
topology: tpu7x:2x2x1
jax: 0.10.0
libtpu: 0.0.40
codegen_flags: <defaults>
</compile_context>

<pallas_src>
import functools

import jax
import jax.numpy as jnp
from jax.experimental import pallas as pl
from jax.experimental.pallas import tpu as pltpu


def _round_up(x, m):
    return ((x + m - 1) // m) * m


def _bce_v2_kernel(*refs, has_weights: bool, has_rating: bool):
    """One grid step: per-row (rating-scaled) loss for a (tb, N) tile."""
    idx = 0
    y_pred_ref = refs[idx]; idx += 1
    y_gt_ref = refs[idx]; idx += 1
    w_ref = None
    if has_weights:
        w_ref = refs[idx]; idx += 1
    r_ref = None
    if has_rating:
        r_ref = refs[idx]; idx += 1
    out_ref = refs[idx]                        # (tb, 1) per-row losses

    x = y_pred_ref[...].astype(jnp.float32)    # (tb, N) logits
    y = y_gt_ref[...].astype(jnp.float32)      # (tb, N) targets

    # num_pos = (y > 0).sum(-1, keepdims); num_neg = (y == 0).sum(-1, keepdims)
    num_pos = jnp.sum((y > 0.0).astype(jnp.float32), axis=-1, keepdims=True)
    num_neg = jnp.sum((y == 0.0).astype(jnp.float32), axis=-1, keepdims=True)
    intr_w = num_pos * y + num_neg * (1.0 - y)

    # BCEWithLogitsLoss(reduction='none'), numerically stable form:
    #   max(x, 0) - x*y + log1p(exp(-|x|))
    loss = jnp.maximum(x, 0.0) - x * y + jnp.log1p(jnp.exp(-jnp.abs(x)))

    if has_weights:
        # w_ref is (tb, N) for per-element weights or (1, N) for a per-class
        # vector; jnp broadcasting handles both.
        loss = loss * w_ref[...].astype(jnp.float32)

    # Exact reciprocal (approx=True drifts ~1e-3; divide semantics required to
    # match the PyTorch reference within tight tolerance).
    inv_w = pl.reciprocal(intr_w, approx=False)
    row = jnp.sum(loss * inv_w, axis=-1, keepdims=True)   # (tb, 1)

    if has_rating:
        row = row * r_ref[...].astype(jnp.float32)

    out_ref[...] = row


def _choose_tb(b, n, tiled_itemsize_sum, vmem_input_budget=8 << 20, tb_cap=1024):
    """Largest row tile (multiple of 8) whose double-buffered row-tiled inputs
    fit the VMEM input budget (conservative across v5e/v6e/v7x scoped limits)."""
    bytes_per_row = max(1, tiled_itemsize_sum) * n
    tb = vmem_input_budget // (2 * bytes_per_row)   # 2x for double buffering
    tb = int(max(8, min(tb, tb_cap)))
    tb = (tb // 8) * 8
    tb = min(tb, _round_up(b, 8))
    return max(8, tb)


def bce_loss_v2(y_pred, y_gt, weights=None, rating=None, *, tb=None):
    """Pallas TPU implementation of BCELossV2.forward (logits=True)."""
    n = y_pred.shape[-1]
    lead_shape = y_pred.shape[:-1]
    yp = y_pred.reshape(-1, n)
    yg = y_gt.reshape(-1, n)
    b = yp.shape[0]

    # --- weights: specialize (None / per-class vector / full per-element) ---
    has_weights = weights is not None
    weights_is_vector = False
    w_arr = None
    if has_weights:
        w = jnp.asarray(weights)
        if w.ndim < 2 or all(d == 1 for d in w.shape[:-1]):
            # per-class (or scalar) weight: keep as (1, N), broadcast in-kernel
            weights_is_vector = True
            w_arr = jnp.broadcast_to(w, (1, n)).reshape(1, n)
        else:
            w_arr = jnp.broadcast_to(w, y_pred.shape).reshape(b, n)

    # --- rating: per-row scalar ---
    has_rating = rating is not None
    r_arr = None
    if has_rating:
        r_arr = jnp.broadcast_to(jnp.asarray(rating), lead_shape).reshape(b, 1)

    # --- tile selection (only inputs tiled along the row axis count) ---
    tiled_itemsize = yp.dtype.itemsize + yg.dtype.itemsize
    if has_weights and not weights_is_vector:
        tiled_itemsize += w_arr.dtype.itemsize
    if tb is None:
        tb = _choose_tb(b, n, tiled_itemsize)
    else:
        tb = max(8, (int(tb) // 8) * 8)
        tb = min(tb, _round_up(b, 8))
    # TODO(synk): for extremely wide N (N*itemsize*16 > VMEM budget even at
    # tb=8) a second grid axis over N with a row-accumulator would be needed.

    # --- pad rows so the grid divides evenly; padded rows are sliced off ---
    b_pad = _round_up(b, tb)
    if b_pad != b:
        pad = b_pad - b
        yp = jnp.pad(yp, ((0, pad), (0, 0)))
        yg = jnp.pad(yg, ((0, pad), (0, 0)))
        if has_weights and not weights_is_vector:
            w_arr = jnp.pad(w_arr, ((0, pad), (0, 0)))
        if has_rating:
            r_arr = jnp.pad(r_arr, ((0, pad), (0, 0)))

    grid = (b_pad // tb,)

    in_specs = [
        pl.BlockSpec((tb, n), lambda i: (i, 0)),   # y_pred
        pl.BlockSpec((tb, n), lambda i: (i, 0)),   # y_gt
    ]
    args = [yp, yg]
    if has_weights:
        if weights_is_vector:
            in_specs.append(pl.BlockSpec((1, n), lambda i: (0, 0)))   # (1, N)
        else:
            in_specs.append(pl.BlockSpec((tb, n), lambda i: (i, 0)))  # (B, N)
        args.append(w_arr)
    if has_rating:
        in_specs.append(pl.BlockSpec((tb, 1), lambda i: (i, 0)))
        args.append(r_arr)

    kernel = functools.partial(
        _bce_v2_kernel, has_weights=has_weights, has_rating=has_rating)

    rows = pl.pallas_call(
        kernel,
        out_shape=jax.ShapeDtypeStruct((b_pad, 1), jnp.float32),
        grid_spec=pltpu.PrefetchScalarGridSpec(
            num_scalar_prefetch=0,
            grid=grid,
            in_specs=in_specs,
            out_specs=pl.BlockSpec((tb, 1), lambda i: (i, 0)),
        ),
        compiler_params=pltpu.CompilerParams(
            # independent per-row tiles -> parallel axis (v7x megacore shards it)
            dimension_semantics=("parallel",),
            vmem_limit_bytes=32 << 20,
        ),
    )(*args)

    # tiny final reduction (B floats) done in XLA; padded rows dropped
    return jnp.mean(rows[:b, 0])


def _reference(y_pred, y_gt, weights=None, rating=None):
    """Pure-JAX reference matching the PyTorch module."""
    y_pred = y_pred.astype(jnp.float32)
    y_gt = y_gt.astype(jnp.float32)
    num_pos = jnp.sum(y_gt > 0.0, axis=-1, keepdims=True).astype(jnp.float32)
    num_neg = jnp.sum(y_gt == 0.0, axis=-1, keepdims=True).astype(jnp.float32)
    intr_w = num_pos * y_gt + num_neg * (1.0 - y_gt)
    bce = (jnp.maximum(y_pred, 0.0) - y_pred * y_gt
           + jnp.log1p(jnp.exp(-jnp.abs(y_pred))))
    loss = bce
    if weights is not None:
        loss = loss * jnp.asarray(weights, jnp.float32)
    loss = jnp.sum(loss / intr_w, axis=-1)
    if rating is not None:
        loss = loss * jnp.asarray(rating, jnp.float32)
    return jnp.mean(loss)


if __name__ == "__main__":
    key = jax.random.PRNGKey(0)
    k1, k2, k3, k4 = jax.random.split(key, 4)

    B, N = 16, 256
    y_pred = jax.random.normal(k1, (B, N), dtype=jnp.float32)          # logits
    y_gt = (jax.random.uniform(k2, (B, N)) > 0.7).astype(jnp.float32)  # binary targets
    weights_full = jax.random.uniform(k3, (B, N), dtype=jnp.float32) + 0.5
    weights_vec = jax.random.uniform(k3, (N,), dtype=jnp.float32) + 0.5
    rating = jax.random.uniform(k4, (B,), dtype=jnp.float32) + 0.5

    # 1) default path (weights=None, rating=None) -> only 2 input streams
    out0 = jax.block_until_ready(bce_loss_v2(y_pred, y_gt))
    ref0 = _reference(y_pred, y_gt)
    assert jnp.allclose(out0, ref0, rtol=1e-5, atol=1e-6), (out0, ref0)

    # 2) full per-element weights + per-row rating
    out1 = jax.block_until_ready(bce_loss_v2(y_pred, y_gt, weights_full, rating))
    ref1 = _reference(y_pred, y_gt, weights_full, rating)
    assert jnp.allclose(out1, ref1, rtol=1e-5, atol=1e-6), (out1, ref1)

    # 3) per-class weight vector: stays (1, N) in HBM, broadcast in-kernel
    out2 = jax.block_until_ready(bce_loss_v2(y_pred, y_gt, weights_vec, rating))
    ref2 = _reference(y_pred, y_gt, weights_vec, rating)
    assert jnp.allclose(out2, ref2, rtol=1e-5, atol=1e-6), (out2, ref2)

    # 4) bf16 inputs + higher-rank / non-multiple-of-8 rows (padding path)
    y_pred3 = jax.random.normal(k1, (2, 7, N), dtype=jnp.bfloat16)
    y_gt3 = (jax.random.uniform(k2, (2, 7, N)) > 0.5).astype(jnp.bfloat16)
    out3 = jax.block_until_ready(bce_loss_v2(y_pred3, y_gt3))
    ref3 = _reference(y_pred3.astype(jnp.float32), y_gt3.astype(jnp.float32))
    assert jnp.allclose(out3, ref3, rtol=1e-4, atol=1e-5), (out3, ref3)

    print("KERNEL_OK")
</pallas_src>

<mosaic_0001>
module attributes {stable_mosaic.version = 11 : i64} {
  func.func @_bce_v2_kernel(%arg0: i32, %arg1: memref<16x256xf32, #tpu.memory_space<vmem>>, %arg2: memref<16x256xf32, #tpu.memory_space<vmem>>, %arg3: memref<16x1xf32, #tpu.memory_space<vmem>>) attributes {dimension_semantics = [#tpu.dimension_semantics<parallel>], iteration_bounds = array<i64: 1>, scalar_prefetch = 0 : i64, scratch_operands = 0 : i64, tpu.core_type = #tpu.core_type<tc>, window_params = [{transform_indices = @transform_0, window_bounds = array<i64: 16, 256>}, {transform_indices = @transform_1, window_bounds = array<i64: 16, 256>}, {transform_indices = @transform_2, window_bounds = array<i64: 16, 1>}]} {
    %c0 = arith.constant 0 : index
    %c0_0 = arith.constant 0 : index
    %0 = vector.load %arg1[%c0, %c0_0] : memref<16x256xf32, #tpu.memory_space<vmem>>, vector<16x256xf32>
    %c0_1 = arith.constant 0 : index
    %c0_2 = arith.constant 0 : index
    %1 = vector.load %arg2[%c0_1, %c0_2] : memref<16x256xf32, #tpu.memory_space<vmem>>, vector<16x256xf32>
    %cst = arith.constant 0.000000e+00 : f32
    %2 = vector.broadcast %cst : f32 to vector<16x256xf32>
    %3 = arith.cmpf ogt, %1, %2 : vector<16x256xf32>
    %4 = arith.extui %3 : vector<16x256xi1> to vector<16x256xi32>
    %5 = arith.sitofp %4 : vector<16x256xi32> to vector<16x256xf32>
    %cst_3 = arith.constant dense<0.000000e+00> : vector<16xf32>
    %6 = vector.multi_reduction <add>, %5, %cst_3 [1] : vector<16x256xf32> to vector<16xf32>
    %7 = vector.shape_cast %6 : vector<16xf32> to vector<16x1xf32>
    %cst_4 = arith.constant 0.000000e+00 : f32
    %8 = vector.broadcast %cst_4 : f32 to vector<16x256xf32>
    %9 = arith.cmpf oeq, %1, %8 : vector<16x256xf32>
    %10 = arith.extui %9 : vector<16x256xi1> to vector<16x256xi32>
    %11 = arith.sitofp %10 : vector<16x256xi32> to vector<16x256xf32>
    %cst_5 = arith.constant dense<0.000000e+00> : vector<16xf32>
    %12 = vector.multi_reduction <add>, %11, %cst_5 [1] : vector<16x256xf32> to vector<16xf32>
    %13 = vector.shape_cast %12 : vector<16xf32> to vector<16x1xf32>
    %14 = vector.broadcast %7 : vector<16x1xf32> to vector<16x256xf32>
    %15 = arith.mulf %14, %1 : vector<16x256xf32>
    %cst_6 = arith.constant 1.000000e+00 : f32
    %16 = vector.broadcast %cst_6 : f32 to vector<16x256xf32>
    %17 = arith.subf %16, %1 : vector<16x256xf32>
    %18 = vector.broadcast %13 : vector<16x1xf32> to vector<16x256xf32>
    %19 = arith.mulf %18, %17 : vector<16x256xf32>
    %20 = arith.addf %15, %19 : vector<16x256xf32>
    %cst_7 = arith.constant 0.000000e+00 : f32
    %21 = vector.broadcast %cst_7 : f32 to vector<16x256xf32>
    %22 = arith.maximumf %0, %21 : vector<16x256xf32>
    %23 = arith.mulf %0, %1 : vector<16x256xf32>
    %24 = arith.subf %22, %23 : vector<16x256xf32>
    %25 = math.absf %0 : vector<16x256xf32>
    %cst_8 = arith.constant 0.000000e+00 : f32
    %26 = vector.broadcast %cst_8 : f32 to vector<16x256xf32>
    %27 = arith.subf %26, %25 : vector<16x256xf32>
    %28 = math.exp %27 : vector<16x256xf32>
    %29 = math.log1p %28 : vector<16x256xf32>
    %30 = arith.addf %24, %29 : vector<16x256xf32>
    %31 = tpu.reciprocal %20 : vector<16x256xf32> -> vector<16x256xf32>
    %32 = arith.mulf %30, %31 : vector<16x256xf32>
    %cst_9 = arith.constant dense<0.000000e+00> : vector<16xf32>
    %33 = vector.multi_reduction <add>, %32, %cst_9 [1] : vector<16x256xf32> to vector<16xf32>
    %34 = vector.shape_cast %33 : vector<16xf32> to vector<16x1xf32>
    %c0_10 = arith.constant 0 : index
    %c0_11 = arith.constant 0 : index
    %35 = vector.load %arg3[%c0_10, %c0_11] : memref<16x1xf32, #tpu.memory_space<vmem>>, vector<16x1xf32>
    tpu.vector_store %arg3[%c0_10, %c0_11], %34 {strides = array<i32>} : memref<16x1xf32, #tpu.memory_space<vmem>>, vector<16x1xf32>,
    return
  }
  func.func @transform_0(%arg0: i32) -> (i32, i32) {
    %c0_i32 = arith.constant 0 : i32
    %c0_i32_0 = arith.constant 0 : i32
    return %arg0, %c0_i32 : i32, i32
  }
  func.func @transform_1(%arg0: i32) -> (i32, i32) {
    %c0_i32 = arith.constant 0 : i32
    %c0_i32_0 = arith.constant 0 : i32
    return %arg0, %c0_i32 : i32, i32
  }
  func.func @transform_2(%arg0: i32) -> (i32, i32) {
    %c0_i32 = arith.constant 0 : i32
    %c0_i32_0 = arith.constant 0 : i32
    return %arg0, %c0_i32 : i32, i32
  }
}

</mosaic_0001>

<bundles_post_ra>
// kernel: tpu_custom_call.1
= control target key start
LH: loop header
LB: loop body
LE: loop exit
PB: predicated region body
PF: predicated region fallthrough
CT: control target
= control target key end

     0   :  { %7 = vsyncpa [#allocation3], 0  ;;  %s387_s0 = inlined_call_operand.hbm [shape: f32[16,256], index: 0, kind: input, shape index: {}]   ;;  %s388_s1 = inlined_call_operand.hbm [shape: f32[16,256], index: 1, kind: input, shape index: {}]   ;;  %s389_s2 = inlined_call_operand.vmem [shape: f32[16,1], index: 2, kind: output, shape index: {}]  }
   0x1   :  { %8 = vsyncpa [#allocation5], 0  ;;  %s275_s9 = smov [#allocation2]   ;;  %s227_s13 = scalar_lea.hbm %s387_s0, 512 }
   0x2   :  { %s14_s10 = sshll.u32 %s275_s9, 4  ;;  %p228_p0 = scmp.ne.s32.totalorder %s387_s0, %s227_s13  ;;  %s15_s10 = int_to_ptr.vmem [resolvable:$true] %s14_s10 }
   0x3   :  { %p231_p1 = scmp.lt.u32.totalorder %s227_s13, %s387_s0 }
   0x5   :  { %p233_p2 = pnand %p231_p1, %p228_p0 }
   0x7   :  { %236 = shalt.err (!%p233_p2)
}
   0x8   :  { %s237_s18 = scalar_lea.vmem %s15_s10, 512  ;;  %p242_p4 = scmp.lt.s32.totalorder %s15_s10, %s15_s10 }
   0x9   :  { %p238_p3 = scmp.ne.s32.totalorder %s15_s10, %s237_s18  ;;  %p243_p5 = scmp.lt.s32.totalorder %s237_s18, %s237_s18 }
   0xb   :  { %p244_p6 = por %p243_p5, %p242_p4 }
   0xd   :  { %p245_p7 = pnand %p244_p6, %p238_p3 }
   0xf   :  { %248 = shalt.err (!%p245_p7)
}
  0x10   :  { %s276_s19 = smov 256   ;;  %s277_s20 = smov 16  }
  0x11   :  { %20 = dma.hbm_to_vmem [thread:$0]  %s387_s0, 512, %s15_s10, [#allocation3], %s276_s19, %s276_s19, %s277_s20  }
  0x12   :  { %s278_s23 = smov [#allocation4]   ;;  %s249_s27 = scalar_lea.hbm %s388_s1, 512 }
  0x13   :  { %s26_s24 = sshll.u32 %s278_s23, 4  ;;  %p250_p8 = scmp.ne.s32.totalorder %s388_s1, %s249_s27  ;;  %s27_s24 = int_to_ptr.vmem [resolvable:$true] %s26_s24 }
  0x14   :  { %p253_p9 = scmp.lt.u32.totalorder %s249_s27, %s388_s1 }
  0x16   :  { %p255_p10 = pnand %p253_p9, %p250_p8 }
  0x18   :  { %258 = shalt.err (!%p255_p10)
}
  0x19   :  { %s259_s4 = scalar_lea.vmem %s27_s24, 512  ;;  %p264_p12 = scmp.lt.s32.totalorder %s27_s24, %s27_s24 }
  0x1a   :  { %p260_p11 = scmp.ne.s32.totalorder %s27_s24, %s259_s4  ;;  %p265_p13 = scmp.lt.s32.totalorder %s259_s4, %s259_s4 }
  0x1c   :  { %p266_p0 = por %p265_p13, %p264_p12 }
  0x1e   :  { %p267_p1 = pnand %p266_p0, %p260_p11 }
  0x20   :  { %270 = shalt.err (!%p267_p1)
}
  0x21   :  { %32 = dma.hbm_to_vmem [thread:$0]  %s388_s1, 512, %s27_s24, [#allocation5], %s276_s19, %s276_s19, %s277_s20  }
  0x22   :  { %271 = dma.done.wait [#allocation3], 512  }
  0x23   :  { %272 = vsyncadd [#allocation3], 4294966784 }
  0x24   :  { %273 = dma.done.wait [#allocation5], 512  }
  0x25   :  { %274 = vsyncadd [#allocation5], 4294966784  ;;  %v319_v0 = vld [vmem:[#allocation4] sm:$0xff]  ;;  %v321_v1 = vld [vmem:[#allocation4 + $0x8] sm:$0xff]  ;;  %v279_v4 = vmov 0.0   ;;  %vm181_vm12 = vcmask 7168  }
  0x26   :  { %v323_v2 = vld [vmem:[#allocation4 + $0x10] sm:$0xff]  ;;  %vm65_vm0 = vcmp.eq.f32.partialorder %v319_v0, 0.0  ;;  %vm66_vm1 = vcmp.eq.f32.partialorder %v321_v1, 0.0  ;;  %vm47_vm2 = vcmp.gt.f32.partialorder %v319_v0, 0.0  ;;  %vm48_vm3 = vcmp.gt.f32.partialorder %v321_v1, 0.0  ;;  %v329_v3 = vld [vmem:[#allocation4 + $0x18] sm:$0xff] }
  0x27   :  { %v194_v5 = vsel %vm65_vm0, 1.0, %v279_v4  ;;  %v195_v6 = vsel %vm66_vm1, 1.0, %v279_v4  ;;  %v190_v7 = vsel %vm47_vm2, 1.0, %v279_v4  ;;  %v191_v8 = vsel %vm48_vm3, 1.0, %v279_v4  ;;  %v39_v17 = vld [vmem:[#allocation2] sm:$0xff]  ;;  %v40_v18 = vld [vmem:[#allocation2 + $0x8] sm:$0xff] }
  0x28   :  { %v77_v9 = vadd.f32 %v195_v6, %v194_v5  ;;  %v59_v10 = vadd.f32 %v191_v8, %v190_v7  ;;  %vm67_vm4 = vcmp.eq.f32.partialorder %v323_v2, 0.0  ;;  %vm68_vm5 = vcmp.eq.f32.partialorder %v329_v3, 0.0  ;;  %v335_v21 = vld [vmem:[#allocation2 + $0x10] sm:$0xff]  ;;  %v337_v22 = vld [vmem:[#allocation2 + $0x18] sm:$0xff] }
  0x29   :  { %v196_v11 = vsel %vm67_vm4, 1.0, %v279_v4  ;;  %v197_v12 = vsel %vm68_vm5, 1.0, %v279_v4  ;;  %vm49_vm6 = vcmp.gt.f32.partialorder %v323_v2, 0.0  ;;  %vm50_vm7 = vcmp.gt.f32.partialorder %v329_v3, 0.0 }
  0x2a   :  { %78 = vadd.xlane.f32.xlu1 %v77_v9  ;;  %60 = vadd.xlane.f32.xlu0 %v59_v10  ;;  %v80_v13 = vadd.f32 %v197_v12, %v196_v11  ;;  %v192_v14 = vsel %vm49_vm6, 1.0, %v279_v4  ;;  %v193_v15 = vsel %vm50_vm7, 1.0, %v279_v4  ;;  %v111_v19 = vand.u32 2147483647, %v39_v17 }
  0x2b   :  { %v62_v16 = vadd.f32 %v193_v15, %v192_v14  ;;  %v112_v20 = vand.u32 2147483647, %v40_v18  ;;  %v113_v24 = vand.u32 2147483647, %v335_v21  ;;  %v114_v26 = vand.u32 2147483647, %v337_v22 }
  0x2c   :  { %v115_v23 = vsub.f32 0.0, %v111_v19  ;;  %v87_v43 = vsub.f32 1.0, %v319_v0  ;;  %v88_v44 = vsub.f32 1.0, %v321_v1  ;;  %v99_v45 = vmax.f32 %v39_v17, 0.0 }
  0x2d   :  { %v116_v25 = vsub.f32 0.0, %v112_v20  ;;  %v117_v28 = vsub.f32 0.0, %v113_v24  ;;  %v118_v30 = vsub.f32 0.0, %v114_v26  ;;  %v100_v46 = vmax.f32 %v40_v18, 0.0 }
  0x2e   :  { %81 = vadd.xlane.f32.xlu1 %v80_v13  ;;  %63 = vadd.xlane.f32.xlu0 %v62_v16  ;;  %v119_v27 = vmul.f32 1.442695, %v115_v23  ;;  %v103_v47 = vmul.f32 %v319_v0, %v39_v17  ;;  %v104_v48 = vmul.f32 %v321_v1, %v40_v18  ;;  %v89_v54 = vsub.f32 1.0, %v323_v2 }
  0x2f   :  { %v121_v29 = vmul.f32 1.442695, %v116_v25  ;;  %v123_v31 = vmul.f32 1.442695, %v117_v28  ;;  %v125_v32 = vmul.f32 1.442695, %v118_v30 }
  0x30   :  { %203 = vpow2.f32 %v119_v27  ;;  %v90_v55 = vsub.f32 1.0, %v329_v3  ;;  %v107_v63 = vsub.f32 %v99_v45, %v103_v47  ;;  %v108_v4 = vsub.f32 %v100_v46, %v104_v48 }
  0x31   :  { %205 = vpow2.f32 %v121_v29  ;;  %v101_v27 = vmax.f32 %v335_v21, 0.0  ;;  %v102_v28 = vmax.f32 %v337_v22, 0.0 }
  0x32   :  { %207 = vpow2.f32 %v123_v31  ;;  %v105_v31 = vmul.f32 %v323_v2, %v335_v21 }
  0x33   :  { %209 = vpow2.f32 %v125_v32  ;;  %v106_v32 = vmul.f32 %v329_v3, %v337_v22 }
  0x34   :  { %v109_v21 = vsub.f32 %v101_v27, %v105_v31 }
  0x3a   :  { %v204_v33 = vpop.eup %203 }
  0x3b   :  { %v206_v34 = vpop.eup %205  ;;  %v127_v35 = vadd.f32 1.0, %v204_v33  ;;  %v130_v41 = vmul.f32 -0.5, %v204_v33  ;;  %v133_v50 = vand.u32 2147483647, %v204_v33 }
  0x3c   :  { %v341_v36 = vpop.eup %207  ;;  %v136_v37 = vadd.f32 1.0, %v206_v34  ;;  %v139_v42 = vmul.f32 -0.5, %v206_v34  ;;  %v142_v51 = vand.u32 2147483647, %v206_v34 }
  0x3d   :  { %v343_v38 = vpop.eup %209  ;;  %211 = vlog2.f32 %v127_v35  ;;  %v145_v39 = vadd.f32 1.0, %v341_v36  ;;  %v131_v49 = vadd.f32 1.0, %v130_v41  ;;  %v148_v57 = vmul.f32 -0.5, %v341_v36 }
  0x3e   :  { %213 = vlog2.f32 %v136_v37  ;;  %v154_v40 = vadd.f32 1.0, %v343_v38  ;;  %v140_v56 = vadd.f32 1.0, %v139_v42  ;;  %v157_v6 = vmul.f32 -0.5, %v343_v38 }
  0x3f   :  { %215 = vlog2.f32 %v145_v39  ;;  %v132_v5 = vmul.f32 %v204_v33, %v131_v49  ;;  %vm357_vm8 = vcmp.lt.f32.partialorder %v133_v50, 0.0004427343  ;;  %vm361_vm9 = vcmp.lt.f32.partialorder %v142_v51, 0.0004427343 }
  0x40   :  { %217 = vlog2.f32 %v154_v40  ;;  %v149_v14 = vadd.f32 1.0, %v148_v57  ;;  %v151_v15 = vand.u32 2147483647, %v341_v36  ;;  %v158_v24 = vadd.f32 1.0, %v157_v6 }
  0x41   :  { %v160_v29 = vand.u32 2147483647, %v343_v38 }
  0x42   :  { %v150_v33 = vmul.f32 %v341_v36, %v149_v14  ;;  %vm152_vm10 = vcmp.lt.f32.partialorder %v151_v15, 0.0004427343  ;;  %v159_v40 = vmul.f32 %v343_v38, %v158_v24 }
  0x43   :  { %vm161_vm11 = vcmp.lt.f32.partialorder %v160_v29, 0.0004427343 }
  0x47   :  { %v212_v58 = vpop.eup %211 }
  0x48   :  { %v214_v7 = vpop.eup %213  ;;  %v129_v13 = vmul.f32 0.6931472, %v212_v58 }
  0x49   :  { %v216_v19 = vpop.eup %215  ;;  %v138_v23 = vmul.f32 0.6931472, %v214_v7 }
  0x4a   :  { %v218_v25 = vpop.eup %217  ;;  %v147_v35 = vmul.f32 0.6931472, %v216_v19 }
  0x4b   :  { %v156_v39 = vmul.f32 0.6931472, %v218_v25 }
  0x4c   :  { %v153_v22 = vsel %vm152_vm10, %v150_v33, %v147_v35 }
  0x4d   :  { %v162_v36 = vsel %vm161_vm11, %v159_v40, %v156_v39  ;;  %v165_v45 = vadd.f32 %v153_v22, %v109_v21 }
  0xb7   :  { %v79_v52 = vpop.xlane.xlu1 %78  ;;  %v61_v53 = vpop.xlane.xlu0 %60 }
  0xb8   :  { %v91_v59 = vmul.f32 %v87_v43, %v79_v52  ;;  %v92_v60 = vmul.f32 %v88_v44, %v79_v52  ;;  %v83_v61 = vmul.f32 %v61_v53, %v319_v0  ;;  %v84_v62 = vmul.f32 %v61_v53, %v321_v1 }
  0xb9   :  { %v141_v1 = vmul.f32 %v206_v34, %v140_v56  ;;  %v135_v34 = vsel %vm357_vm8, %v132_v5, %v129_v13 }
  0xba   :  { %v95_v8 = vadd.f32 %v91_v59, %v83_v61  ;;  %v96_v9 = vadd.f32 %v92_v60, %v84_v62 }
  0xbb   :  { %v82_v12 = vpop.xlane.xlu1 %81  ;;  %v64_v0 = vpop.xlane.xlu0 %63  ;;  %v144_v37 = vsel %vm361_vm9, %v141_v1, %v138_v23 }
  0xbc   :  { %219 = vrcp.f32 %v95_v8  ;;  %v93_v16 = vmul.f32 %v89_v54, %v82_v12  ;;  %v94_v17 = vmul.f32 %v90_v55, %v82_v12  ;;  %v85_v18 = vmul.f32 %v64_v0, %v323_v2 }
  0xbd   :  { %221 = vrcp.f32 %v96_v9  ;;  %v86_v20 = vmul.f32 %v64_v0, %v329_v3  ;;  %v163_v2 = vadd.f32 %v135_v34, %v107_v63  ;;  %v164_v41 = vadd.f32 %v144_v37, %v108_v4 }
  0xbe   :  { %v97_v26 = vadd.f32 %v93_v16, %v85_v18  ;;  %v110_v3 = vsub.f32 %v102_v28, %v106_v32 }
  0xbf   :  { %v98_v30 = vadd.f32 %v94_v17, %v86_v20 }
  0xc0   :  { %223 = vrcp.f32 %v97_v26  ;;  %v166_v47 = vadd.f32 %v162_v36, %v110_v3 }
  0xc1   :  { %225 = vrcp.f32 %v98_v30 }
  0xc6   :  { %v220_v42 = vpop.eup %219 }
  0xc7   :  { %v222_v43 = vpop.eup %221  ;;  %v171_v44 = vmul.f32 %v220_v42, %v163_v2 }
  0xc8   :  { %v172_v46 = vmul.f32 %v222_v43, %v164_v41 }
  0xca   :  { %v224_v48 = vpop.eup %223  ;;  %v175_v49 = vadd.f32 %v172_v46, %v171_v44 }
  0xcb   :  { %v226_v50 = vpop.eup %225  ;;  %v173_v51 = vmul.f32 %v224_v48, %v165_v45 }
  0xcc   :  { %176 = vadd.xlane.f32.xlu0 %v175_v49  ;;  %v174_v52 = vmul.f32 %v226_v50, %v166_v47 }
  0xce   :  { %v178_v38 = vadd.f32 %v174_v52, %v173_v51 }
  0xd0   :  { %179 = vadd.xlane.f32.xlu1 %v178_v38 }
 0x159   :  { %v177_v53 = vpop.xlane.xlu0 %176 }
 0x15a   :  { %182 = vst.msk [vmem:[%s389_s2] sm:$0xff] %vm181_vm12, %v177_v53 }
 0x15d   :  { %v180_v54 = vpop.xlane.xlu1 %179 }
 0x15e   :  { %183 = vst.msk [vmem:[%s389_s2 + $0x8] sm:$0xff] %vm181_vm12, %v180_v54 }
 0x15f   :  { %188 = vsyncpa [#allocation3], 1 }
 0x160   :  { %189 = vsyncpa [#allocation5], 1 }

</bundles_post_ra>
